<compile_context>
chip_gen: v7x
topology: tpu7x:2x2x1
jax: 0.10.0
libtpu: 0.0.40
codegen_flags: <defaults>
</compile_context>

<pallas_src>
import functools

import jax
import jax.numpy as jnp
from jax.experimental import pallas as pl
from jax.experimental.pallas import tpu as pltpu


def _round_up(n, m):
    return ((n + m - 1) // m) * m


def _cdiv(a, b):
    return -(-a // b)


def mlp_kernel(x_ref,
               w1_ref, b1_ref,
               w2_ref, b2_ref,
               w3_ref, b3_ref,
               w4_ref, b4_ref,
               w5_ref, b5_ref,
               out_ref, *, alpha_size, use_butterfly):
    d_io = out_ref.shape[-1]                                  # 8 * alpha (lane-dense)

    def dense_relu(h_bf16, w_ref, b_ref):
        y = jnp.dot(h_bf16, w_ref[...],
                    preferred_element_type=jnp.float32)      # MXU, bf16 in / f32 acc
        # bias-add + ReLU in f32 (VPU), then keep the activation in bf16 so the
        # inter-layer temporaries and the next MXU feed are half-width.
        return jnp.maximum(y + b_ref[...], 0.0).astype(jnp.bfloat16)

    h = x_ref[...].astype(jnp.bfloat16)                       # no-op if x is already bf16
    h = dense_relu(h, w1_ref, b1_ref)
    h = dense_relu(h, w2_ref, b2_ref)
    h = dense_relu(h, w3_ref, b3_ref)
    h = dense_relu(h, w4_ref, b4_ref)
    logits = jnp.dot(h, w5_ref[...],
                     preferred_element_type=jnp.float32) + b5_ref[...]   # (TB, d_io) f32

    a = alpha_size
    if use_butterfly:
        # Lane-dense segmented log-softmax.  Groups are contiguous `a`-lane
        # segments (lane j = g*a + i).  For power-of-two `a`, the XOR-partner
        # of lane j at butterfly distance s is lane (j ^ s), which never
        # crosses a segment boundary, so an exact all-reduce per segment is a
        # log2(a)-step butterfly of global rolls + selects on full vregs.
        lane = jax.lax.broadcasted_iota(jnp.int32, (1, d_io), 1)
        masks = []                                            # hoisted, reused by both trees
        s = 1
        while s < a:
            src_pos = pltpu.roll(lane, shift=s, axis=1)
            # True where the +shift roll delivers the XOR-partner lane; this is
            # computed from the rolled iota, so it is robust to pltpu.roll's
            # shift-direction convention.
            masks.append((s, src_pos == (lane ^ s)))
            s *= 2

        def seg_allreduce(vals, op):
            y = vals
            for s, take_pos in masks:
                r_pos = pltpu.roll(y, shift=s, axis=1)
                r_neg = pltpu.roll(y, shift=d_io - s, axis=1)
                partner = jnp.where(take_pos, r_pos, r_neg)
                y = op(y, partner)
            return y

        m = seg_allreduce(logits, jnp.maximum)                # group max, broadcast per lane
        shifted = logits - m
        sumexp = seg_allreduce(jnp.exp(shifted), jnp.add)     # exact group sum, broadcast
        out = shifted - jnp.log(sumexp)                       # dense EUP log
    else:
        # Fallback (alpha not a power-of-two multiple of 16): lane-sparse reshape path.
        tb = logits.shape[0]
        l3 = logits.reshape(tb, 8, a)
        m = jnp.max(l3, axis=-1, keepdims=True)
        shifted = l3 - m
        lse = jnp.log(jnp.sum(jnp.exp(shifted), axis=-1, keepdims=True))
        out = (shifted - lse).reshape(tb, d_io)

    out_ref[...] = out.astype(out_ref.dtype)                  # lane-dense (TB, d_io) store


def prepare_params(params, alpha_size):
    """One-time weight prep: transpose to (in,out), zero-pad hidden dims to
    128-multiples, cast weights to bf16.  Biases stay f32, shaped (1, out).

    Padding invariant: padded W columns AND the matching padded bias lanes are
    zero, so ReLU(0 + 0) = 0 and the padded rows of the next weight are also
    zero -- padded lanes never leak into real outputs."""
    d_io = 8 * alpha_size
    dims = [(d_io, 150), (150, 100), (100, 50), (50, 100), (100, d_io)]
    prepped = []
    for i, (in_d, out_d) in enumerate(dims, start=1):
        wt = jnp.transpose(params[f"w{i}"])                   # (in, out)
        b = params[f"b{i}"]
        in_p = in_d if i == 1 else _round_up(in_d, 128)       # keep real input dim
        out_p = out_d if i == 5 else _round_up(out_d, 128)    # keep real output dim
        wp = jnp.zeros((in_p, out_p), jnp.float32).at[:in_d, :out_d].set(wt)
        bp = jnp.zeros((1, out_p), jnp.float32).at[0, :out_d].set(b)
        prepped.append(wp.astype(jnp.bfloat16))
        prepped.append(bp)
    return prepped


def mlp_forward(x, prepped_params, alpha_size, *, tb_cap=1024, out_dtype=jnp.float32):
    """x: (B, 8, alpha_size), float32 or bfloat16.  prepped_params: prepare_params output.

    tb_cap is the sweepable batch-tile cap (1024 default; try 2048 for very
    large B).  Passing bf16 x (cast fused upstream) and/or out_dtype=bf16
    halves activation HBM bytes on memory-bound v6e/v7x."""
    B, eight, A = x.shape
    assert eight == 8 and A == alpha_size
    d_io = 8 * A
    x2d = x.reshape(B, d_io)                                  # == x.view(B, -1), dtype preserved

    bf16_rows = (x.dtype == jnp.bfloat16) or (out_dtype == jnp.bfloat16)
    align = 16 if bf16_rows else 8                            # sublane packing granularity

    # Tile selection: big balanced tiles, but always >= 2 grid steps when the
    # batch is large enough so the "parallel" axis feeds both v7x TensorCores.
    B_al = _round_up(B, align)
    n_steps = max(1, _cdiv(B_al, tb_cap))
    if n_steps == 1 and B_al >= 2 * align:
        n_steps = 2
    TB = _round_up(_cdiv(B_al, n_steps), align)
    B_pad = _round_up(B, TB)
    grid = B_pad // TB

    if B_pad != B:
        x2d = jnp.pad(x2d, ((0, B_pad - B), (0, 0)))

    use_butterfly = (A & (A - 1) == 0) and (d_io % 128 == 0)
    kernel = functools.partial(mlp_kernel, alpha_size=A, use_butterfly=use_butterfly)

    in_specs = [pl.BlockSpec((TB, d_io), lambda i: (i, 0))]
    for p in prepped_params:
        # Weights/biases: full block, constant index -> stay VMEM-resident,
        # per-step DMAs elided.
        in_specs.append(pl.BlockSpec(p.shape, lambda i: (0, 0)))

    out2d = pl.pallas_call(
        kernel,
        out_shape=jax.ShapeDtypeStruct((B_pad, d_io), out_dtype),
        grid=(grid,),
        in_specs=in_specs,
        out_specs=pl.BlockSpec((TB, d_io), lambda i: (i, 0)),
        compiler_params=pltpu.CompilerParams(
            dimension_semantics=("parallel",),
            vmem_limit_bytes=32 * 1024 * 1024),
    )(x2d, *prepped_params)

    return out2d[:B].reshape(B, 8, A)                         # metadata-only reshape


def init_params(key, alpha_size):
    """Deterministic init matching the PyTorch module's layer shapes (out, in)."""
    dims = [(150, 8 * alpha_size),
            (100, 150),
            (50, 100),
            (100, 50),
            (8 * alpha_size, 100)]
    params = {}
    for i, (out_d, in_d) in enumerate(dims, start=1):
        key, kw, kb = jax.random.split(key, 3)
        bound = 1.0 / jnp.sqrt(in_d)
        params[f"w{i}"] = jax.random.uniform(
            kw, (out_d, in_d), jnp.float32, -bound, bound)
        params[f"b{i}"] = jax.random.uniform(
            kb, (out_d,), jnp.float32, -bound, bound)
    return params


def mlp_ref(x, params, alpha_size):
    """Pure-JAX reference with the same bf16-matmul / f32-accumulate recipe."""
    B = x.shape[0]
    h = x.reshape(B, -1).astype(jnp.float32)
    for i in range(1, 6):
        w = jnp.transpose(params[f"w{i}"]).astype(jnp.bfloat16)
        y = jnp.dot(h.astype(jnp.bfloat16), w,
                    preferred_element_type=jnp.float32) + params[f"b{i}"]
        h = jnp.maximum(y, 0.0) if i < 5 else y
    l3 = h.reshape(B, 8, alpha_size)
    return jax.nn.log_softmax(l3, axis=-1)


if __name__ == "__main__":
    alpha_size = 16          # 8 * alpha_size = 128 -> lane-dense in/out, butterfly path
    key = jax.random.PRNGKey(0)
    key, kx1, kx2 = jax.random.split(key, 3)
    params = init_params(key, alpha_size)
    prepped = prepare_params(params, alpha_size)               # one-time prep

    # Case 1: tiny batch, f32 in / f32 out (single grid step).
    batch1 = 2
    x1 = jax.random.normal(kx1, (batch1, 8, alpha_size), jnp.float32)
    out1 = jax.block_until_ready(mlp_forward(x1, prepped, alpha_size))
    assert out1.shape == (batch1, 8, alpha_size)
    row_sums = jnp.sum(jnp.exp(out1), axis=-1)
    assert bool(jnp.all(jnp.abs(row_sums - 1.0) < 1e-4))
    ref1 = mlp_ref(x1, params, alpha_size)
    assert bool(jnp.allclose(out1, ref1, atol=2e-3, rtol=2e-3))

    # Case 2: larger batch, bf16 input ("producer-fused" cast simulated here),
    # multi-step grid with batch padding.
    batch2 = 40
    x2 = jax.random.normal(kx2, (batch2, 8, alpha_size), jnp.float32)
    out2 = jax.block_until_ready(
        mlp_forward(x2.astype(jnp.bfloat16), prepped, alpha_size))
    assert out2.shape == (batch2, 8, alpha_size)
    ref2 = mlp_ref(x2, params, alpha_size)                     # ref casts x -> bf16 internally
    assert bool(jnp.allclose(out2, ref2, atol=2e-3, rtol=2e-3))

    print("KERNEL_OK")
</pallas_src>

<mosaic_0001>
module attributes {stable_mosaic.version = 11 : i64} {
  func.func @mlp_kernel(%arg0: i32, %arg1: memref<8x128xf32, #tpu.memory_space<vmem>>, %arg2: memref<128x256xbf16, #tpu.memory_space<vmem>>, %arg3: memref<1x256xf32, #tpu.memory_space<vmem>>, %arg4: memref<256x128xbf16, #tpu.memory_space<vmem>>, %arg5: memref<1x128xf32, #tpu.memory_space<vmem>>, %arg6: memref<128x128xbf16, #tpu.memory_space<vmem>>, %arg7: memref<1x128xf32, #tpu.memory_space<vmem>>, %arg8: memref<128x128xbf16, #tpu.memory_space<vmem>>, %arg9: memref<1x128xf32, #tpu.memory_space<vmem>>, %arg10: memref<128x128xbf16, #tpu.memory_space<vmem>>, %arg11: memref<1x128xf32, #tpu.memory_space<vmem>>, %arg12: memref<8x128xf32, #tpu.memory_space<vmem>>) attributes {dimension_semantics = [#tpu.dimension_semantics<parallel>], iteration_bounds = array<i64: 1>, scalar_prefetch = 0 : i64, scratch_operands = 0 : i64, tpu.core_type = #tpu.core_type<tc>, window_params = [{transform_indices = @transform_0, window_bounds = array<i64: 8, 128>}, {pipeline_mode = #tpu.pipeline_mode<synchronous>, transform_indices = @transform_1, window_bounds = array<i64: 128, 256>}, {pipeline_mode = #tpu.pipeline_mode<synchronous>, transform_indices = @transform_2, window_bounds = array<i64: 1, 256>}, {pipeline_mode = #tpu.pipeline_mode<synchronous>, transform_indices = @transform_3, window_bounds = array<i64: 256, 128>}, {pipeline_mode = #tpu.pipeline_mode<synchronous>, transform_indices = @transform_4, window_bounds = array<i64: 1, 128>}, {pipeline_mode = #tpu.pipeline_mode<synchronous>, transform_indices = @transform_5, window_bounds = array<i64: 128, 128>}, {pipeline_mode = #tpu.pipeline_mode<synchronous>, transform_indices = @transform_6, window_bounds = array<i64: 1, 128>}, {pipeline_mode = #tpu.pipeline_mode<synchronous>, transform_indices = @transform_7, window_bounds = array<i64: 128, 128>}, {pipeline_mode = #tpu.pipeline_mode<synchronous>, transform_indices = @transform_8, window_bounds = array<i64: 1, 128>}, {pipeline_mode = #tpu.pipeline_mode<synchronous>, transform_indices = @transform_9, window_bounds = array<i64: 128, 128>}, {pipeline_mode = #tpu.pipeline_mode<synchronous>, transform_indices = @transform_10, window_bounds = array<i64: 1, 128>}, {transform_indices = @transform_11, window_bounds = array<i64: 8, 128>}]} {
    %c0 = arith.constant 0 : index
    %c0_0 = arith.constant 0 : index
    %0 = vector.load %arg1[%c0, %c0_0] : memref<8x128xf32, #tpu.memory_space<vmem>>, vector<8x128xf32>
    %1 = arith.truncf %0 : vector<8x128xf32> to vector<8x128xbf16>
    %c0_1 = arith.constant 0 : index
    %c0_2 = arith.constant 0 : index
    %2 = vector.load %arg2[%c0_1, %c0_2] : memref<128x256xbf16, #tpu.memory_space<vmem>>, vector<128x256xbf16>
    %cst = arith.constant dense<0.000000e+00> : vector<8x256xf32>
    %3 = tpu.matmul %1, %2, %cst {dimension_numbers = #tpu.dot_dimension_numbers<[1], [0], [0], [1], [0, 0, 1, 1], [], []>} : vector<8x128xbf16>, vector<128x256xbf16>, vector<8x256xf32> -> vector<8x256xf32>
    %c0_3 = arith.constant 0 : index
    %c0_4 = arith.constant 0 : index
    %4 = vector.load %arg3[%c0_3, %c0_4] : memref<1x256xf32, #tpu.memory_space<vmem>>, vector<1x256xf32>
    %5 = vector.broadcast %4 : vector<1x256xf32> to vector<8x256xf32>
    %6 = arith.addf %3, %5 : vector<8x256xf32>
    %cst_5 = arith.constant 0.000000e+00 : f32
    %7 = vector.broadcast %cst_5 : f32 to vector<8x256xf32>
    %8 = arith.maximumf %6, %7 : vector<8x256xf32>
    %9 = arith.truncf %8 : vector<8x256xf32> to vector<8x256xbf16>
    %c0_6 = arith.constant 0 : index
    %c0_7 = arith.constant 0 : index
    %10 = vector.load %arg4[%c0_6, %c0_7] : memref<256x128xbf16, #tpu.memory_space<vmem>>, vector<256x128xbf16>
    %cst_8 = arith.constant dense<0.000000e+00> : vector<8x128xf32>
    %11 = tpu.matmul %9, %10, %cst_8 {dimension_numbers = #tpu.dot_dimension_numbers<[1], [0], [0], [1], [0, 0, 1, 1], [], []>} : vector<8x256xbf16>, vector<256x128xbf16>, vector<8x128xf32> -> vector<8x128xf32>
    %c0_9 = arith.constant 0 : index
    %c0_10 = arith.constant 0 : index
    %12 = vector.load %arg5[%c0_9, %c0_10] : memref<1x128xf32, #tpu.memory_space<vmem>>, vector<1x128xf32>
    %13 = vector.broadcast %12 : vector<1x128xf32> to vector<8x128xf32>
    %14 = arith.addf %11, %13 : vector<8x128xf32>
    %cst_11 = arith.constant 0.000000e+00 : f32
    %15 = vector.broadcast %cst_11 : f32 to vector<8x128xf32>
    %16 = arith.maximumf %14, %15 : vector<8x128xf32>
    %17 = arith.truncf %16 : vector<8x128xf32> to vector<8x128xbf16>
    %c0_12 = arith.constant 0 : index
    %c0_13 = arith.constant 0 : index
    %18 = vector.load %arg6[%c0_12, %c0_13] : memref<128x128xbf16, #tpu.memory_space<vmem>>, vector<128x128xbf16>
    %cst_14 = arith.constant dense<0.000000e+00> : vector<8x128xf32>
    %19 = tpu.matmul %17, %18, %cst_14 {dimension_numbers = #tpu.dot_dimension_numbers<[1], [0], [0], [1], [0, 0, 1, 1], [], []>} : vector<8x128xbf16>, vector<128x128xbf16>, vector<8x128xf32> -> vector<8x128xf32>
    %c0_15 = arith.constant 0 : index
    %c0_16 = arith.constant 0 : index
    %20 = vector.load %arg7[%c0_15, %c0_16] : memref<1x128xf32, #tpu.memory_space<vmem>>, vector<1x128xf32>
    %21 = vector.broadcast %20 : vector<1x128xf32> to vector<8x128xf32>
    %22 = arith.addf %19, %21 : vector<8x128xf32>
    %cst_17 = arith.constant 0.000000e+00 : f32
    %23 = vector.broadcast %cst_17 : f32 to vector<8x128xf32>
    %24 = arith.maximumf %22, %23 : vector<8x128xf32>
    %25 = arith.truncf %24 : vector<8x128xf32> to vector<8x128xbf16>
    %c0_18 = arith.constant 0 : index
    %c0_19 = arith.constant 0 : index
    %26 = vector.load %arg8[%c0_18, %c0_19] : memref<128x128xbf16, #tpu.memory_space<vmem>>, vector<128x128xbf16>
    %cst_20 = arith.constant dense<0.000000e+00> : vector<8x128xf32>
    %27 = tpu.matmul %25, %26, %cst_20 {dimension_numbers = #tpu.dot_dimension_numbers<[1], [0], [0], [1], [0, 0, 1, 1], [], []>} : vector<8x128xbf16>, vector<128x128xbf16>, vector<8x128xf32> -> vector<8x128xf32>
    %c0_21 = arith.constant 0 : index
    %c0_22 = arith.constant 0 : index
    %28 = vector.load %arg9[%c0_21, %c0_22] : memref<1x128xf32, #tpu.memory_space<vmem>>, vector<1x128xf32>
    %29 = vector.broadcast %28 : vector<1x128xf32> to vector<8x128xf32>
    %30 = arith.addf %27, %29 : vector<8x128xf32>
    %cst_23 = arith.constant 0.000000e+00 : f32
    %31 = vector.broadcast %cst_23 : f32 to vector<8x128xf32>
    %32 = arith.maximumf %30, %31 : vector<8x128xf32>
    %33 = arith.truncf %32 : vector<8x128xf32> to vector<8x128xbf16>
    %c0_24 = arith.constant 0 : index
    %c0_25 = arith.constant 0 : index
    %34 = vector.load %arg10[%c0_24, %c0_25] : memref<128x128xbf16, #tpu.memory_space<vmem>>, vector<128x128xbf16>
    %cst_26 = arith.constant dense<0.000000e+00> : vector<8x128xf32>
    %35 = tpu.matmul %33, %34, %cst_26 {dimension_numbers = #tpu.dot_dimension_numbers<[1], [0], [0], [1], [0, 0, 1, 1], [], []>} : vector<8x128xbf16>, vector<128x128xbf16>, vector<8x128xf32> -> vector<8x128xf32>
    %c0_27 = arith.constant 0 : index
    %c0_28 = arith.constant 0 : index
    %36 = vector.load %arg11[%c0_27, %c0_28] : memref<1x128xf32, #tpu.memory_space<vmem>>, vector<1x128xf32>
    %37 = vector.broadcast %36 : vector<1x128xf32> to vector<8x128xf32>
    %38 = arith.addf %35, %37 : vector<8x128xf32>
    %39 = tpu.iota {dimensions = array<i32: 1>} : vector<1x128xi32>
    %c1_i32 = arith.constant 1 : i32
    %40 = tpu.dynamic_rotate %39 by %c1_i32 dim 1 : vector<1x128xi32>, i32 -> vector<1x128xi32>
    %c1_i32_29 = arith.constant 1 : i32
    %41 = vector.broadcast %c1_i32_29 : i32 to vector<1x128xi32>
    %42 = arith.xori %39, %41 : vector<1x128xi32>
    %43 = arith.cmpi eq, %40, %42 : vector<1x128xi32>
    %c2_i32 = arith.constant 2 : i32
    %44 = tpu.dynamic_rotate %39 by %c2_i32 dim 1 : vector<1x128xi32>, i32 -> vector<1x128xi32>
    %c2_i32_30 = arith.constant 2 : i32
    %45 = vector.broadcast %c2_i32_30 : i32 to vector<1x128xi32>
    %46 = arith.xori %39, %45 : vector<1x128xi32>
    %47 = arith.cmpi eq, %44, %46 : vector<1x128xi32>
    %c4_i32 = arith.constant 4 : i32
    %48 = tpu.dynamic_rotate %39 by %c4_i32 dim 1 : vector<1x128xi32>, i32 -> vector<1x128xi32>
    %c4_i32_31 = arith.constant 4 : i32
    %49 = vector.broadcast %c4_i32_31 : i32 to vector<1x128xi32>
    %50 = arith.xori %39, %49 : vector<1x128xi32>
    %51 = arith.cmpi eq, %48, %50 : vector<1x128xi32>
    %c8_i32 = arith.constant 8 : i32
    %52 = tpu.dynamic_rotate %39 by %c8_i32 dim 1 : vector<1x128xi32>, i32 -> vector<1x128xi32>
    %c8_i32_32 = arith.constant 8 : i32
    %53 = vector.broadcast %c8_i32_32 : i32 to vector<1x128xi32>
    %54 = arith.xori %39, %53 : vector<1x128xi32>
    %55 = arith.cmpi eq, %52, %54 : vector<1x128xi32>
    %c1_i32_33 = arith.constant 1 : i32
    %56 = tpu.dynamic_rotate %38 by %c1_i32_33 dim 1 : vector<8x128xf32>, i32 -> vector<8x128xf32>
    %c127_i32 = arith.constant 127 : i32
    %57 = tpu.dynamic_rotate %38 by %c127_i32 dim 1 : vector<8x128xf32>, i32 -> vector<8x128xf32>
    %58 = vector.shape_cast %43 : vector<1x128xi1> to vector<1x128xi1>
    %59 = vector.broadcast %58 : vector<1x128xi1> to vector<8x128xi1>
    %60 = arith.select %59, %56, %57 : vector<8x128xi1>, vector<8x128xf32>
    %61 = arith.maximumf %38, %60 : vector<8x128xf32>
    %c2_i32_34 = arith.constant 2 : i32
    %62 = tpu.dynamic_rotate %61 by %c2_i32_34 dim 1 : vector<8x128xf32>, i32 -> vector<8x128xf32>
    %c126_i32 = arith.constant 126 : i32
    %63 = tpu.dynamic_rotate %61 by %c126_i32 dim 1 : vector<8x128xf32>, i32 -> vector<8x128xf32>
    %64 = vector.shape_cast %47 : vector<1x128xi1> to vector<1x128xi1>
    %65 = vector.broadcast %64 : vector<1x128xi1> to vector<8x128xi1>
    %66 = arith.select %65, %62, %63 : vector<8x128xi1>, vector<8x128xf32>
    %67 = arith.maximumf %61, %66 : vector<8x128xf32>
    %c4_i32_35 = arith.constant 4 : i32
    %68 = tpu.dynamic_rotate %67 by %c4_i32_35 dim 1 : vector<8x128xf32>, i32 -> vector<8x128xf32>
    %c124_i32 = arith.constant 124 : i32
    %69 = tpu.dynamic_rotate %67 by %c124_i32 dim 1 : vector<8x128xf32>, i32 -> vector<8x128xf32>
    %70 = vector.shape_cast %51 : vector<1x128xi1> to vector<1x128xi1>
    %71 = vector.broadcast %70 : vector<1x128xi1> to vector<8x128xi1>
    %72 = arith.select %71, %68, %69 : vector<8x128xi1>, vector<8x128xf32>
    %73 = arith.maximumf %67, %72 : vector<8x128xf32>
    %c8_i32_36 = arith.constant 8 : i32
    %74 = tpu.dynamic_rotate %73 by %c8_i32_36 dim 1 : vector<8x128xf32>, i32 -> vector<8x128xf32>
    %c120_i32 = arith.constant 120 : i32
    %75 = tpu.dynamic_rotate %73 by %c120_i32 dim 1 : vector<8x128xf32>, i32 -> vector<8x128xf32>
    %76 = vector.shape_cast %55 : vector<1x128xi1> to vector<1x128xi1>
    %77 = vector.broadcast %76 : vector<1x128xi1> to vector<8x128xi1>
    %78 = arith.select %77, %74, %75 : vector<8x128xi1>, vector<8x128xf32>
    %79 = arith.maximumf %73, %78 : vector<8x128xf32>
    %80 = arith.subf %38, %79 : vector<8x128xf32>
    %81 = math.exp %80 : vector<8x128xf32>
    %c1_i32_37 = arith.constant 1 : i32
    %82 = tpu.dynamic_rotate %81 by %c1_i32_37 dim 1 : vector<8x128xf32>, i32 -> vector<8x128xf32>
    %c127_i32_38 = arith.constant 127 : i32
    %83 = tpu.dynamic_rotate %81 by %c127_i32_38 dim 1 : vector<8x128xf32>, i32 -> vector<8x128xf32>
    %84 = vector.shape_cast %43 : vector<1x128xi1> to vector<1x128xi1>
    %85 = vector.broadcast %84 : vector<1x128xi1> to vector<8x128xi1>
    %86 = arith.select %85, %82, %83 : vector<8x128xi1>, vector<8x128xf32>
    %87 = arith.addf %81, %86 : vector<8x128xf32>
    %c2_i32_39 = arith.constant 2 : i32
    %88 = tpu.dynamic_rotate %87 by %c2_i32_39 dim 1 : vector<8x128xf32>, i32 -> vector<8x128xf32>
    %c126_i32_40 = arith.constant 126 : i32
    %89 = tpu.dynamic_rotate %87 by %c126_i32_40 dim 1 : vector<8x128xf32>, i32 -> vector<8x128xf32>
    %90 = vector.shape_cast %47 : vector<1x128xi1> to vector<1x128xi1>
    %91 = vector.broadcast %90 : vector<1x128xi1> to vector<8x128xi1>
    %92 = arith.select %91, %88, %89 : vector<8x128xi1>, vector<8x128xf32>
    %93 = arith.addf %87, %92 : vector<8x128xf32>
    %c4_i32_41 = arith.constant 4 : i32
    %94 = tpu.dynamic_rotate %93 by %c4_i32_41 dim 1 : vector<8x128xf32>, i32 -> vector<8x128xf32>
    %c124_i32_42 = arith.constant 124 : i32
    %95 = tpu.dynamic_rotate %93 by %c124_i32_42 dim 1 : vector<8x128xf32>, i32 -> vector<8x128xf32>
    %96 = vector.shape_cast %51 : vector<1x128xi1> to vector<1x128xi1>
    %97 = vector.broadcast %96 : vector<1x128xi1> to vector<8x128xi1>
    %98 = arith.select %97, %94, %95 : vector<8x128xi1>, vector<8x128xf32>
    %99 = arith.addf %93, %98 : vector<8x128xf32>
    %c8_i32_43 = arith.constant 8 : i32
    %100 = tpu.dynamic_rotate %99 by %c8_i32_43 dim 1 : vector<8x128xf32>, i32 -> vector<8x128xf32>
    %c120_i32_44 = arith.constant 120 : i32
    %101 = tpu.dynamic_rotate %99 by %c120_i32_44 dim 1 : vector<8x128xf32>, i32 -> vector<8x128xf32>
    %102 = vector.shape_cast %55 : vector<1x128xi1> to vector<1x128xi1>
    %103 = vector.broadcast %102 : vector<1x128xi1> to vector<8x128xi1>
    %104 = arith.select %103, %100, %101 : vector<8x128xi1>, vector<8x128xf32>
    %105 = arith.addf %99, %104 : vector<8x128xf32>
    %106 = math.log %105 : vector<8x128xf32>
    %107 = arith.subf %80, %106 : vector<8x128xf32>
    %c0_45 = arith.constant 0 : index
    %c0_46 = arith.constant 0 : index
    %108 = vector.load %arg12[%c0_45, %c0_46] : memref<8x128xf32, #tpu.memory_space<vmem>>, vector<8x128xf32>
    tpu.vector_store %arg12[%c0_45, %c0_46], %107 {strides = array<i32>} : memref<8x128xf32, #tpu.memory_space<vmem>>, vector<8x128xf32>,
    return
  }
  func.func @transform_0(%arg0: i32) -> (i32, i32) {
    %c0_i32 = arith.constant 0 : i32
    %c0_i32_0 = arith.constant 0 : i32
    return %arg0, %c0_i32 : i32, i32
  }
  func.func @transform_1(%arg0: i32) -> (i32, i32) {
    %c0_i32 = arith.constant 0 : i32
    %c0_i32_0 = arith.constant 0 : i32
    %c0_i32_1 = arith.constant 0 : i32
    return %c0_i32, %c0_i32_0 : i32, i32
  }
  func.func @transform_2(%arg0: i32) -> (i32, i32) {
    %c0_i32 = arith.constant 0 : i32
    %c0_i32_0 = arith.constant 0 : i32
    %c0_i32_1 = arith.constant 0 : i32
    return %c0_i32, %c0_i32_0 : i32, i32
  }
  func.func @transform_3(%arg0: i32) -> (i32, i32) {
    %c0_i32 = arith.constant 0 : i32
    %c0_i32_0 = arith.constant 0 : i32
    %c0_i32_1 = arith.constant 0 : i32
    return %c0_i32, %c0_i32_0 : i32, i32
  }
  func.func @transform_4(%arg0: i32) -> (i32, i32) {
    %c0_i32 = arith.constant 0 : i32
    %c0_i32_0 = arith.constant 0 : i32
    %c0_i32_1 = arith.constant 0 : i32
    return %c0_i32, %c0_i32_0 : i32, i32
  }
  func.func @transform_5(%arg0: i32) -> (i32, i32) {
    %c0_i32 = arith.constant 0 : i32
    %c0_i32_0 = arith.constant 0 : i32
    %c0_i32_1 = arith.constant 0 : i32
    return %c0_i32, %c0_i32_0 : i32, i32
  }
  func.func @transform_6(%arg0: i32) -> (i32, i32) {
    %c0_i32 = arith.constant 0 : i32
    %c0_i32_0 = arith.constant 0 : i32
    %c0_i32_1 = arith.constant 0 : i32
    return %c0_i32, %c0_i32_0 : i32, i32
  }
  func.func @transform_7(%arg0: i32) -> (i32, i32) {
    %c0_i32 = arith.constant 0 : i32
    %c0_i32_0 = arith.constant 0 : i32
    %c0_i32_1 = arith.constant 0 : i32
    return %c0_i32, %c0_i32_0 : i32, i32
  }
  func.func @transform_8(%arg0: i32) -> (i32, i32) {
    %c0_i32 = arith.constant 0 : i32
    %c0_i32_0 = arith.constant 0 : i32
    %c0_i32_1 = arith.constant 0 : i32
    return %c0_i32, %c0_i32_0 : i32, i32
  }
  func.func @transform_9(%arg0: i32) -> (i32, i32) {
    %c0_i32 = arith.constant 0 : i32
    %c0_i32_0 = arith.constant 0 : i32
    %c0_i32_1 = arith.constant 0 : i32
    return %c0_i32, %c0_i32_0 : i32, i32
  }
  func.func @transform_10(%arg0: i32) -> (i32, i32) {
    %c0_i32 = arith.constant 0 : i32
    %c0_i32_0 = arith.constant 0 : i32
    %c0_i32_1 = arith.constant 0 : i32
    return %c0_i32, %c0_i32_0 : i32, i32
  }
  func.func @transform_11(%arg0: i32) -> (i32, i32) {
    %c0_i32 = arith.constant 0 : i32
    %c0_i32_0 = arith.constant 0 : i32
    return %arg0, %c0_i32 : i32, i32
  }
}

</mosaic_0001>

<bundles_post_ra>
// kernel: tpu_custom_call.1
= control target key start
LH: loop header
LB: loop body
LE: loop exit
PB: predicated region body
PF: predicated region fallthrough
CT: control target
= control target key end

     0   :  { %16 = vsyncpa [#allocation3], 0  ;;  %s1623_s0 = inlined_call_operand.hbm [shape: f32[8,128], index: 0, kind: input, shape index: {}]   ;;  %s1624_s1 = inlined_call_operand.hbm [shape: bf16[128,256], index: 1, kind: input, shape index: {}]   ;;  %s1625_s2 = inlined_call_operand.vmem [shape: f32[1,256], index: 2, kind: input, shape index: {}]   ;;  %s1626_s3 = inlined_call_operand.hbm [shape: bf16[256,128], index: 3, kind: input, shape index: {}]   ;;  %s1627_s4 = inlined_call_operand.vmem [shape: f32[1,128], index: 4, kind: input, shape index: {}]   ;;  %s1628_s5 = inlined_call_operand.hbm [shape: bf16[128,128], index: 5, kind: input, shape index: {}]   ;;  %s1629_s6 = inlined_call_operand.vmem [shape: f32[1,128], index: 6, kind: input, shape index: {}]   ;;  %s1630_s7 = inlined_call_operand.hbm [shape: bf16[128,128], index: 7, kind: input, shape index: {}]   ;;  %s1631_s8 = inlined_call_operand.vmem [shape: f32[1,128], index: 8, kind: input, shape index: {}]   ;;  %s1632_s9 = inlined_call_operand.hbm [shape: bf16[128,128], index: 9, kind: input, shape index: {}]   ;;  %s1633_s10 = inlined_call_operand.vmem [shape: f32[1,128], index: 10, kind: input, shape index: {}]   ;;  %s1634_s11 = inlined_call_operand.hbm [shape: f32[8,128], index: 11, kind: output, shape index: {}]  }
   0x1   :  { %17 = vsyncpa [#allocation6], 0 }
   0x2   :  { %18 = vsyncpa [#allocation9], 0 }
   0x3   :  { %19 = vsyncpa [#allocation12], 0 }
   0x4   :  { %20 = vsyncpa [#allocation4], 0  ;;  %s1325_s17 = smov [#allocation5]   ;;  %s1161_s21 = scalar_lea.hbm %s1624_s1, 2048 }
   0x5   :  { %s36_s18 = sshll.u32 %s1325_s17, 4  ;;  %p1162_p0 = scmp.ne.s32.totalorder %s1624_s1, %s1161_s21  ;;  %s37_s18 = int_to_ptr.vmem [resolvable:$true] %s36_s18 }
   0x6   :  { %p1165_p1 = scmp.lt.u32.totalorder %s1161_s21, %s1624_s1 }
   0x8   :  { %p1167_p2 = pnand %p1165_p1, %p1162_p0 }
   0xa   :  { %1170 = shalt.err (!%p1167_p2)
}
   0xb   :  { %s1171_s26 = scalar_lea.vmem %s37_s18, 2048  ;;  %p1176_p4 = scmp.lt.s32.totalorder %s37_s18, %s37_s18 }
   0xc   :  { %p1172_p3 = scmp.ne.s32.totalorder %s37_s18, %s1171_s26  ;;  %p1177_p5 = scmp.lt.s32.totalorder %s1171_s26, %s1171_s26 }
   0xe   :  { %p1178_p6 = por %p1177_p5, %p1176_p4 }
  0x10   :  { %p1179_p7 = pnand %p1178_p6, %p1172_p3 }
  0x12   :  { %1182 = shalt.err (!%p1179_p7)
}
  0x13   :  { %s1326_s27 = smov 128   ;;  %s1327_s28 = smov 8  }
  0x14   :  { %42 = dma.hbm_to_vmem [thread:$0]  %s1624_s1, 2048, %s37_s18, [#allocation6], %s1326_s27, %s1326_s27, %s1327_s28  }
  0x15   :  { %s1328_s12 = smov [#allocation8]   ;;  %s1329_s14 = smov [#allocation2]  }
  0x16   :  { %s64_s13 = sshll.u32 %s1328_s12, 4  ;;  %s27_s15 = sshll.u32 %s1329_s14, 4  ;;  %s65_s13 = int_to_ptr.vmem [resolvable:$true] %s64_s13  ;;  %s28_s15 = int_to_ptr.vmem [resolvable:$true] %s27_s15 }
  0x17   :  { %s1183_s19 = scalar_lea.hbm %s1628_s5, 1024 }
  0x18   :  { %p1184_p8 = scmp.ne.s32.totalorder %s1628_s5, %s1183_s19  ;;  %p1187_p9 = scmp.lt.u32.totalorder %s1183_s19, %s1628_s5 }
  0x1a   :  { %p1189_p10 = pnand %p1187_p9, %p1184_p8 }
  0x1c   :  { %1192 = shalt.err (!%p1189_p10)
}
  0x1d   :  { %s1193_s1 = scalar_lea.vmem %s65_s13, 1024  ;;  %p1198_p12 = scmp.lt.s32.totalorder %s65_s13, %s65_s13 }
  0x1e   :  { %p1194_p11 = scmp.ne.s32.totalorder %s65_s13, %s1193_s1  ;;  %p1199_p13 = scmp.lt.s32.totalorder %s1193_s1, %s1193_s1 }
  0x20   :  { %p1200_p0 = por %p1199_p13, %p1198_p12 }
  0x22   :  { %p1201_p1 = pnand %p1200_p0, %p1194_p11 }
  0x24   :  { %1204 = shalt.err (!%p1201_p1)
}
  0x25   :  { %s1330_s18 = smov 64   ;;  %s1331_s24 = smov 4  }
  0x26   :  { %70 = dma.hbm_to_vmem [thread:$0]  %s1628_s5, 1024, %s65_s13, [#allocation9], %s1330_s18, %s1330_s18, %s1331_s24  }
  0x27   :  { %s1205_s30 = scalar_lea.hbm %s1623_s0, 128 }
  0x28   :  { %p1206_p2 = scmp.ne.s32.totalorder %s1623_s0, %s1205_s30  ;;  %p1209_p3 = scmp.lt.u32.totalorder %s1205_s30, %s1623_s0 }
  0x2a   :  { %p1211_p4 = pnand %p1209_p3, %p1206_p2 }
  0x2c   :  { %1214 = shalt.err (!%p1211_p4)
}
  0x2d   :  { %s1215_s19 = scalar_lea.vmem %s28_s15, 128  ;;  %p1220_p6 = scmp.lt.s32.totalorder %s28_s15, %s28_s15 }
  0x2e   :  { %p1216_p5 = scmp.ne.s32.totalorder %s28_s15, %s1215_s19  ;;  %p1221_p7 = scmp.lt.s32.totalorder %s1215_s19, %s1215_s19 }
  0x30   :  { %p1222_p8 = por %p1221_p7, %p1220_p6 }
  0x32   :  { %p1223_p9 = pnand %p1222_p8, %p1216_p5 }
  0x34   :  { %1226 = shalt.err (!%p1223_p9)
}
  0x35   :  { %30 = dma.hbm_to_vmem [thread:$0]  %s1623_s0, 128, %s28_s15, [#allocation3]  }
  0x36   :  { %s1332_s20 = smov [#allocation7]   ;;  %s1333_s22 = smov [#allocation10]  }
  0x37   :  { %s50_s21 = sshll.u32 %s1332_s20, 4  ;;  %s78_s23 = sshll.u32 %s1333_s22, 4  ;;  %s51_s21 = int_to_ptr.vmem [resolvable:$true] %s50_s21  ;;  %s79_s23 = int_to_ptr.vmem [resolvable:$true] %s78_s23 }
  0x38   :  { %s1227_s26 = scalar_lea.hbm %s1626_s3, 2048 }
  0x39   :  { %p1228_p10 = scmp.ne.s32.totalorder %s1626_s3, %s1227_s26  ;;  %p1231_p11 = scmp.lt.u32.totalorder %s1227_s26, %s1626_s3 }
  0x3b   :  { %p1233_p12 = pnand %p1231_p11, %p1228_p10 }
  0x3d   :  { %1236 = shalt.err (!%p1233_p12)
}
  0x3e   :  { %s1237_s0 = scalar_lea.vmem %s51_s21, 2048  ;;  %p1242_p0 = scmp.lt.s32.totalorder %s51_s21, %s51_s21 }
  0x3f   :  { %p1238_p13 = scmp.ne.s32.totalorder %s51_s21, %s1237_s0  ;;  %p1243_p1 = scmp.lt.s32.totalorder %s1237_s0, %s1237_s0 }
  0x41   :  { %p1244_p2 = por %p1243_p1, %p1242_p0 }
  0x43   :  { %p1245_p3 = pnand %p1244_p2, %p1238_p13 }
  0x45   :  { %1248 = shalt.err (!%p1245_p3)
}
  0x46   :  { %56 = dma.hbm_to_vmem [thread:$0]  %s1626_s3, 2048, %s51_s21, [#allocation6], %s1330_s18, %s1330_s18, %s1331_s24  }
  0x47   :  { %s1249_s19 = scalar_lea.hbm %s1630_s7, 1024 }
  0x48   :  { %p1250_p4 = scmp.ne.s32.totalorder %s1630_s7, %s1249_s19  ;;  %p1253_p5 = scmp.lt.u32.totalorder %s1249_s19, %s1630_s7 }
  0x4a   :  { %p1255_p6 = pnand %p1253_p5, %p1250_p4 }
  0x4c   :  { %1258 = shalt.err (!%p1255_p6)
}
  0x4d   :  { %s1259_s1 = scalar_lea.vmem %s79_s23, 1024  ;;  %p1264_p8 = scmp.lt.s32.totalorder %s79_s23, %s79_s23 }
  0x4e   :  { %p1260_p7 = scmp.ne.s32.totalorder %s79_s23, %s1259_s1  ;;  %p1265_p9 = scmp.lt.s32.totalorder %s1259_s1, %s1259_s1 }
  0x50   :  { %p1266_p10 = por %p1265_p9, %p1264_p8 }
  0x52   :  { %p1267_p11 = pnand %p1266_p10, %p1260_p7 }
  0x54   :  { %1270 = shalt.err (!%p1267_p11)
}
  0x55   :  { %84 = dma.hbm_to_vmem [thread:$0]  %s1630_s7, 1024, %s79_s23, [#allocation9], %s1330_s18, %s1330_s18, %s1331_s24  }
  0x56   :  { %s1334_s25 = smov [#allocation11]   ;;  %s1271_s30 = scalar_lea.hbm %s1632_s9, 1024 }
  0x57   :  { %s92_s26 = sshll.u32 %s1334_s25, 4  ;;  %p1272_p12 = scmp.ne.s32.totalorder %s1632_s9, %s1271_s30  ;;  %s93_s26 = int_to_ptr.vmem [resolvable:$true] %s92_s26 }
  0x58   :  { %p1275_p13 = scmp.lt.u32.totalorder %s1271_s30, %s1632_s9 }
  0x5a   :  { %p1277_p0 = pnand %p1275_p13, %p1272_p12 }
  0x5c   :  { %1280 = shalt.err (!%p1277_p0)
}
  0x5d   :  { %s1281_s16 = scalar_lea.vmem %s93_s26, 1024  ;;  %p1286_p2 = scmp.lt.s32.totalorder %s93_s26, %s93_s26 }
  0x5e   :  { %p1282_p1 = scmp.ne.s32.totalorder %s93_s26, %s1281_s16  ;;  %p1287_p3 = scmp.lt.s32.totalorder %s1281_s16, %s1281_s16 }
  0x60   :  { %p1288_p4 = por %p1287_p3, %p1286_p2 }
  0x62   :  { %p1289_p5 = pnand %p1288_p4, %p1282_p1 }
  0x64   :  { %1292 = shalt.err (!%p1289_p5)
}
  0x65   :  { %98 = dma.hbm_to_vmem [thread:$0]  %s1632_s9, 1024, %s93_s26, [#allocation12], %s1330_s18, %s1330_s18, %s1331_s24  }
  0x66   :  { %1315 = dma.done.wait [#allocation3], 128  }
  0x67   :  { %1316 = vsyncadd [#allocation3], 4294967168 }
  0x68   :  { %1317 = dma.done.wait [#allocation6], 4096  }
  0x69   :  { %1318 = vsyncadd [#allocation6], 4294963200 }
  0x6a   :  { %1319 = dma.done.wait [#allocation9], 2048  }
  0x6b   :  { %1320 = vsyncadd [#allocation9], 4294965248 }
  0x6c   :  { %1321 = dma.done.wait [#allocation12], 1024  }
  0x6d   :  { %1322 = vsyncadd [#allocation12], 4294966272  ;;  %v1335_v0 = vmov 0   ;;  %v1093_v1 = vld [vmem:[#allocation5 + $0x4] ss:$8 sps:$4 sm:$0xff]   ;;  %v1121_v15 = vld [vmem:[#allocation7 + $0x50] sm:$0xff]   ;;  %v140_v42 = vlaneseq }
  0x6e   :  { %262 = vmatprep.mubr.bf16.mxu0 %v1335_v0  ;;  %v1095_v2 = vld [vmem:[#allocation5] ss:$8 sps:$4 sm:$0xff]   ;;  %230 = vmatprep.subr.bf16.mxu0 %v1093_v1  ;;  %v1096_v3 = vld [vmem:[#allocation5 + $0x14] ss:$8 sps:$4 sm:$0xff]   ;;  %v1098_v4 = vld [vmem:[#allocation5 + $0x10] ss:$8 sps:$4 sm:$0xff]  }
  0x6f   :  { %231 = vmatpush1.bf16.msra.mxu0 %v1095_v2  ;;  %v1099_v5 = vld [vmem:[#allocation5 + $0x24] ss:$8 sps:$4 sm:$0xff]   ;;  %v1101_v6 = vld [vmem:[#allocation5 + $0x20] ss:$8 sps:$4 sm:$0xff]   ;;  %v1102_v7 = vld [vmem:[#allocation5 + $0x34] ss:$8 sps:$4 sm:$0xff]  }
  0x70   :  { %232 = vmatprep.subr.bf16.mxu0 %v1096_v3  ;;  %v1104_v8 = vld [vmem:[#allocation5 + $0x30] ss:$8 sps:$4 sm:$0xff]   ;;  %v1105_v9 = vld [vmem:[#allocation5 + $0x44] ss:$8 sps:$4 sm:$0xff]   ;;  %v1107_v12 = vld [vmem:[#allocation5 + $0x40] ss:$8 sps:$4 sm:$0xff]  }
  0x71   :  { %v1117_v10 = vld [vmem:[#allocation7 + $0x40] sm:$0xff]   ;;  %v1119_v13 = vld [vmem:[#allocation7 + $0x48] sm:$0xff]   ;;  %v1108_v16 = vld [vmem:[#allocation5 + $0x54] ss:$8 sps:$4 sm:$0xff]   ;;  %v1336_v36 = vmov 0.0   ;;  %v141_v43 = vshrl.u32 %v140_v42, 7 }
  0x72   :  { %v1118_v11 = vld [vmem:[#allocation7] sm:$0xff]   ;;  %964 = vmatprep.subr.bf16.mxu1 %v1117_v10  ;;  %v1120_v14 = vld [vmem:[#allocation7 + $0x8] sm:$0xff]   ;;  %v1110_v17 = vld [vmem:[#allocation5 + $0x50] ss:$8 sps:$4 sm:$0xff]   ;;  %vm1337_vm0 = vmmov 0   ;;  %s1338_s5 = smov 1  }
  0x73   :  { %233 = vmatpush1.bf16.msra.mxu0 %v1098_v4  ;;  %965 = vmatpush3.bf16.msra.mxu1 %v1118_v11  ;;  %v1122_v18 = vld [vmem:[#allocation7 + $0x10] sm:$0xff]   ;;  %v1123_v19 = vld [vmem:[#allocation7 + $0x58] sm:$0xff]   ;;  %v1111_v20 = vld [vmem:[#allocation5 + $0x64] ss:$8 sps:$4 sm:$0xff]   ;;  %v1500_v44 = vsub.s32 0, %v141_v43  ;;  %v146_v46 = vsub.s32 1, %v141_v43 }
  0x74   :  { %234 = vmatprep.subr.bf16.mxu0 %v1099_v5  ;;  %966 = vmatprep.subr.bf16.mxu1 %v1119_v13  ;;  %v1113_v21 = vld [vmem:[#allocation5 + $0x60] ss:$8 sps:$4 sm:$0xff]   ;;  %v1114_v22 = vld [vmem:[#allocation5 + $0x74] ss:$8 sps:$4 sm:$0xff]   ;;  %v1116_v26 = vld [vmem:[#allocation5 + $0x70] ss:$8 sps:$4 sm:$0xff]  }
  0x75   :  { %v1124_v23 = vld [vmem:[#allocation7 + $0x18] sm:$0xff]   ;;  %v1125_v24 = vld [vmem:[#allocation7 + $0x60] sm:$0xff]   ;;  %v1127_v28 = vld [vmem:[#allocation7 + $0x68] sm:$0xff]   ;;  %s1339_s1 = smov 127   ;;  %s1342_s3 = smov 124  }
  0x76   :  { %v1126_v25 = vld [vmem:[#allocation7 + $0x20] sm:$0xff]   ;;  %v120_v27 = vld [vmem:[#allocation2] sm:$0xff]  ;;  %v1128_v29 = vld [vmem:[#allocation7 + $0x28] sm:$0xff]   ;;  %s1343_s21 = smov 120   ;;  %s1344_s25 = smov [#allocation13]  }
  0x77   :  { %235 = vmatpush1.bf16.msra.mxu0 %v1101_v6  ;;  %967 = vmatpush3.bf16.msra.mxu1 %v1120_v14  ;;  %v121_v30 = vpack.c.bf16 %v120_v27, %v120_v27  ;;  %v1129_v31 = vld [vmem:[#allocation7 + $0x70] sm:$0xff]   ;;  %v1131_v33 = vld [vmem:[#allocation7 + $0x78] sm:$0xff]   ;;  %v1133_v35 = vld [vmem:[#allocation8] sm:$0xff]  }
  0x78   :  { %236 = vmatprep.subr.bf16.mxu0 %v1102_v7  ;;  %968 = vmatprep.subr.bf16.mxu1 %v1121_v15  ;;  %v1130_v32 = vld [vmem:[#allocation7 + $0x30] sm:$0xff]   ;;  %v1132_v34 = vld [vmem:[#allocation7 + $0x38] sm:$0xff]   ;;  %v1134_v37 = vld [vmem:[#allocation8 + $0x8] sm:$0xff]  }
  0x79   :  { %v1135_v38 = vld [vmem:[#allocation8 + $0x10] sm:$0xff]   ;;  %v1136_v39 = vld [vmem:[#allocation8 + $0x18] sm:$0xff]   ;;  %v1137_v40 = vld [vmem:[#allocation8 + $0x20] sm:$0xff]  }
  0x7a   :  { %v1138_v41 = vld [vmem:[#allocation8 + $0x28] sm:$0xff]   ;;  %v138_v45 = vld [vmem:[%s1625_s2] sm:$0x3]  ;;  %v1139_v59 = vld [vmem:[#allocation8 + $0x30] sm:$0xff]  }
  0x7b   :  { %237 = vmatpush1.bf16.msra.mxu0 %v1104_v8  ;;  %969 = vmatpush3.bf16.msra.mxu1 %v1122_v18  ;;  %v143_v47 = vrot.slane %v138_v45, %v1500_v44  ;;  %v147_v48 = vrot.slane %v138_v45, %v146_v46  ;;  %v1140_v60 = vld [vmem:[#allocation8 + $0x38] sm:$0xff]   ;;  %v1141_v61 = vld [vmem:[#allocation10] sm:$0xff]   ;;  %v1142_v62 = vld [vmem:[#allocation10 + $0x8] sm:$0xff]  }
  0x7c   :  { %238 = vmatprep.subr.bf16.mxu0 %v1105_v9  ;;  %970 = vmatprep.subr.bf16.mxu1 %v1123_v19  ;;  %v1143_v63 = vld [vmem:[#allocation10 + $0x10] sm:$0xff]   ;;  %v1144_v1 = vld [vmem:[#allocation10 + $0x18] sm:$0xff]   ;;  %v1145_v2 = vld [vmem:[#allocation10 + $0x20] sm:$0xff]  }
  0x7d   :  { %v1146_v3 = vld [vmem:[#allocation10 + $0x28] sm:$0xff]   ;;  %v920_v5 = vld [vmem:[%s1627_s4] ss:$0 sm:$0xff]  ;;  %v1147_v13 = vld [vmem:[#allocation10 + $0x30] sm:$0xff]  }
  0x7e   :  { %v1148_v14 = vld [vmem:[#allocation10 + $0x38] sm:$0xff]   ;;  %v1149_v15 = vld [vmem:[#allocation11] sm:$0xff]  }
  0x7f   :  { %239 = vmatpush1.bf16.msra.mxu0 %v1107_v12  ;;  %971 = vmatpush3.bf16.msra.mxu1 %v1124_v23  ;;  %v1152_v18 = vld [vmem:[#allocation11 + $0x18] sm:$0xff]   ;;  %v1153_v19 = vld [vmem:[#allocation11 + $0x20] sm:$0xff]  }
  0x80   :  { %240 = vmatprep.subr.bf16.mxu0 %v1108_v16  ;;  %972 = vmatprep.subr.bf16.mxu1 %v1125_v24  ;;  %v1150_v16 = vld [vmem:[#allocation11 + $0x8] sm:$0xff]  }
  0x83   :  { %241 = vmatpush1.bf16.msra.mxu0 %v1110_v17  ;;  %973 = vmatpush3.bf16.msra.mxu1 %v1126_v25  ;;  %v1151_v17 = vld [vmem:[#allocation11 + $0x10] sm:$0xff]  }
  0x84   :  { %242 = vmatprep.subr.bf16.mxu0 %v1111_v20  ;;  %974 = vmatprep.subr.bf16.mxu1 %v1127_v28  ;;  %v1154_v20 = vld [vmem:[#allocation11 + $0x28] sm:$0xff]  }
  0x87   :  { %243 = vmatpush1.bf16.msra.mxu0 %v1113_v21  ;;  %975 = vmatpush3.bf16.msra.mxu1 %v1128_v29  ;;  %v937_v21 = vld [vmem:[%s1629_s6] ss:$0 sm:$0xff]  ;;  %v1155_v29 = vld [vmem:[#allocation11 + $0x30] sm:$0xff]  }
  0x88   :  { %244 = vmatprep.subr.bf16.mxu0 %v1114_v22  ;;  %976 = vmatprep.subr.bf16.mxu1 %v1129_v31  ;;  %v1535_v31 = vand.u32 127, %v140_v42 }
  0x8a   :  { %791 = vrot.lane.b32.xlu0 %v1535_v31, %s1338_s5 }
  0x8b   :  { %245 = vmatpush1.bf16.msra.mxu0 %v1116_v26  ;;  %977 = vmatpush3.bf16.msra.mxu1 %v1130_v32  ;;  %v946_v32 = vld [vmem:[%s1631_s8] ss:$0 sm:$0xff]  ;;  %s1340_s8 = smov 2  }
  0x8c   :  { %978 = vmatprep.subr.bf16.mxu1 %v1131_v33  ;;  %1013 = vmatprep.subr.bf16.mxu0 %v1336_v36 }
  0x8e   :  { %263 = vmatmul.mubr.bf16.vlgmr.msra.gmra.mrb[0].mxu0 %v121_v30  ;;  %v1156_v30 = vld [vmem:[#allocation11 + $0x38] sm:$0xff]  }
  0x8f   :  { %979 = vmatpush3.bf16.msra.mxu1 %v1132_v34  ;;  %1014 = vmatpush3.bf16.msra.mxu0 %v1133_v35 }
  0x90   :  { %1033 = vmatprep.subr.bf16.mxu1 %v1336_v36  ;;  %1015 = vmatprep.subr.bf16.mxu0 %v1336_v36 }
  0x91   :  { %1029 = vmatprep.mubr.msk.bf16.mxu0 %vm1337_vm0, %v1336_v36 }
  0x93   :  { %1016 = vmatpush3.bf16.msra.mxu0 %v1134_v37 }
  0x94   :  { %1017 = vmatprep.subr.bf16.mxu0 %v1336_v36 }
  0x97   :  { %1018 = vmatpush3.bf16.msra.mxu0 %v1135_v38 }
  0x98   :  { %1019 = vmatprep.subr.bf16.mxu0 %v1336_v36 }
  0x9b   :  { %1020 = vmatpush3.bf16.msra.mxu0 %v1136_v39 }
  0x9c   :  { %1021 = vmatprep.subr.bf16.mxu0 %v1336_v36 }
  0x9f   :  { %1022 = vmatpush3.bf16.msra.mxu0 %v1137_v40  ;;  %v955_v40 = vld [vmem:[%s1633_s10] ss:$0 sm:$0xff]  ;;  %s1341_s10 = smov 126  }
  0xa0   :  { %1023 = vmatprep.subr.bf16.mxu0 %v1336_v36 }
  0xa3   :  { %1024 = vmatpush3.bf16.msra.mxu0 %v1138_v41 }
  0xa4   :  { %1025 = vmatprep.subr.bf16.mxu0 %v1336_v36 }
  0xa7   :  { %1026 = vmatpush3.bf16.msra.mxu0 %v1139_v59 }
  0xa8   :  { %1027 = vmatprep.subr.bf16.mxu0 %v1336_v36 }
  0xab   :  { %1028 = vmatpush3.bf16.msra.mxu0 %v1140_v60 }
  0xac   :  { %1053 = vmatprep.subr.bf16.mxu0 %v1336_v36 }
 0x161   :  { %v264_v49 = vpop.f32.mrb[0].mxu0 }
 0x162   :  { %v265_v50 = vadd.f32 %v264_v49, %v143_v47  ;;  %v266_v51 = vpop.f32.mrb[1].mxu0  ;;  %v793_v47 = vxor.u32 1, %v1535_v31 }
 0x163   :  { %v267_v52 = vadd.f32 %v266_v51, %v147_v48  ;;  %v268_v53 = vpop.f32.mrb[2].mxu0  ;;  %v792_v48 = vpop.permute.xlu0 %791 }
 0x164   :  { %v271_v54 = vmax.f32 %v265_v50, 0.0  ;;  %v269_v55 = vpop.f32.mrb[3].mxu0  ;;  %vm794_vm1 = vcmp.eq.s32.totalorder %v792_v48, %v793_v47 }
 0x165   :  { %v272_v56 = vmax.f32 %v267_v52, 0.0  ;;  %v811_v49 = vsel %vm794_vm1, 1, %v1335_v0 }
 0x166   :  { %v273_v58 = vpack.c.bf16 %v271_v54, %v271_v54  ;;  %v815_v50 = vrot.slane %v811_v49, %v1500_v44 }
 0x167   :  { %v274_v57 = vpack.c.bf16 %v272_v56, %v272_v56  ;;  %v797_v56 = vxor.u32 2, %v1535_v31 }
 0x168   :  { %vm1552_vm2 = vcmp.eq.s32.totalorder %v815_v50, 1 }
 0x169   :  { %442 = vmatprep.mubr.bf16.mxu1 %v274_v57 }
 0x16a   :  { %443 = vmatmul.mubr.bf16.vlgmr.msra.gmra.mrb[0].mxu1 %v273_v58 }
 0x16b   :  { %1049 = vmatprep.mubr.msk.bf16.mxu1 %vm1337_vm0, %v1336_v36  ;;  %1034 = vmatpush3.bf16.msra.mxu1 %v1141_v61 }
 0x16c   :  { %1035 = vmatprep.subr.bf16.mxu1 %v1336_v36 }
 0x16f   :  { %1036 = vmatpush3.bf16.msra.mxu1 %v1142_v62 }
 0x170   :  { %1037 = vmatprep.subr.bf16.mxu1 %v1336_v36 }
 0x173   :  { %1038 = vmatpush3.bf16.msra.mxu1 %v1143_v63 }
 0x174   :  { %1039 = vmatprep.subr.bf16.mxu1 %v1336_v36 }
 0x177   :  { %1040 = vmatpush3.bf16.msra.mxu1 %v1144_v1 }
 0x178   :  { %1041 = vmatprep.subr.bf16.mxu1 %v1336_v36 }
 0x17b   :  { %1042 = vmatpush3.bf16.msra.mxu1 %v1145_v2  ;;  %v801_v2 = vxor.u32 4, %v1535_v31 }
 0x17c   :  { %1043 = vmatprep.subr.bf16.mxu1 %v1336_v36 }
 0x17f   :  { %1044 = vmatpush3.bf16.msra.mxu1 %v1146_v3 }
 0x180   :  { %1045 = vmatprep.subr.bf16.mxu1 %v1336_v36 }
 0x183   :  { %1046 = vmatpush3.bf16.msra.mxu1 %v1147_v13 }
 0x184   :  { %1047 = vmatprep.subr.bf16.mxu1 %v1336_v36 }
 0x187   :  { %1048 = vmatpush3.bf16.msra.mxu1 %v1148_v14 }
 0x23d   :  { %v980_v4 = vpop.f32.mrb[0].mxu1 }
 0x23e   :  { %v981_v6 = vpop.f32.mrb[1].mxu1 }
 0x23f   :  { %v982_v7 = vadd.f32 %v981_v6, %v980_v4  ;;  %v983_v8 = vpop.f32.mrb[2].mxu1 }
 0x240   :  { %v984_v9 = vpop.f32.mrb[3].mxu1 }
 0x241   :  { %v445_v10 = vadd.f32 %v982_v7, %v920_v5 }
 0x243   :  { %v450_v11 = vmax.f32 %v445_v10, 0.0 }
 0x245   :  { %v451_v12 = vpack.c.bf16 %v450_v11, %v450_v11  ;;  %v805_v11 = vxor.u32 8, %v1535_v31 }
 0x247   :  { %1030 = vmatmul.mubr.bf16.vlgmr.msra.gmra.mrb[4].mxu0 %v451_v12 }
 0x248   :  { %1069 = vmatprep.mubr.msk.bf16.mxu0 %vm1337_vm0, %v1336_v36  ;;  %1054 = vmatpush3.bf16.msra.mxu0 %v1149_v15 }
 0x249   :  { %1055 = vmatprep.subr.bf16.mxu0 %v1336_v36 }
 0x24c   :  { %1056 = vmatpush3.bf16.msra.mxu0 %v1150_v16 }
 0x24d   :  { %1057 = vmatprep.subr.bf16.mxu0 %v1336_v36 }
 0x250   :  { %1058 = vmatpush3.bf16.msra.mxu0 %v1151_v17 }
 0x251   :  { %1059 = vmatprep.subr.bf16.mxu0 %v1336_v36 }
 0x254   :  { %1060 = vmatpush3.bf16.msra.mxu0 %v1152_v18 }
 0x255   :  { %1061 = vmatprep.subr.bf16.mxu0 %v1336_v36 }
 0x258   :  { %1062 = vmatpush3.bf16.msra.mxu0 %v1153_v19 }
 0x259   :  { %1063 = vmatprep.subr.bf16.mxu0 %v1336_v36 }
 0x25c   :  { %1064 = vmatpush3.bf16.msra.mxu0 %v1154_v20 }
 0x25d   :  { %1065 = vmatprep.subr.bf16.mxu0 %v1336_v36 }
 0x260   :  { %1066 = vmatpush3.bf16.msra.mxu0 %v1155_v29 }
 0x261   :  { %1067 = vmatprep.subr.bf16.mxu0 %v1336_v36 }
 0x264   :  { %1068 = vmatpush3.bf16.msra.mxu0 %v1156_v30 }
 0x31a   :  { %v557_v22 = vpop.f32.mrb[4].mxu0 }
 0x31b   :  { %v558_v23 = vadd.f32 %v937_v21, %v557_v22  ;;  %v1031_v24 = vpop.f32.mrb[5].mxu0 }
 0x31c   :  { %v560_v25 = vpop.f32.mrb[6].mxu0 }
 0x31d   :  { %v563_v26 = vmax.f32 %v558_v23, 0.0  ;;  %v1032_v27 = vpop.f32.mrb[7].mxu0 }
 0x31f   :  { %v564_v28 = vpack.c.bf16 %v563_v26, %v563_v26 }
 0x321   :  { %1050 = vmatmul.mubr.bf16.vlgmr.msra.gmra.mrb[4].mxu1 %v564_v28 }
 0x3f4   :  { %v670_v33 = vpop.f32.mrb[4].mxu1 }
 0x3f5   :  { %v671_v34 = vadd.f32 %v946_v32, %v670_v33  ;;  %v1051_v35 = vpop.f32.mrb[5].mxu1 }
 0x3f6   :  { %v673_v37 = vpop.f32.mrb[6].mxu1 }
 0x3f7   :  { %v676_v38 = vmax.f32 %v671_v34, 0.0  ;;  %v1052_v39 = vpop.f32.mrb[7].mxu1 }
 0x3f9   :  { %v677_v36 = vpack.c.bf16 %v676_v38, %v676_v38 }
 0x3fb   :  { %1070 = vmatmul.mubr.bf16.vlgmr.msra.gmra.mrb[8].mxu0 %v677_v36 }
 0x4ce   :  { %v783_v41 = vpop.f32.mrb[8].mxu0 }
 0x4cf   :  { %v784_v42 = vadd.f32 %v955_v40, %v783_v41  ;;  %v1071_v43 = vpop.f32.mrb[9].mxu0 }
 0x4d0   :  { %v786_v45 = vpop.f32.mrb[10].mxu0 }
 0x4d1   :  { %809 = vrot.lane.b32.xlu1 %v784_v42, %s1339_s1  ;;  %807 = vrot.lane.b32.xlu0 %v784_v42, %s1338_s5  ;;  %v1072_v46 = vpop.f32.mrb[11].mxu0 }
 0x4d5   :  { %795 = vrot.lane.b32.xlu1 %v1535_v31, %s1340_s8 }
 0x543   :  { %v810_v52 = vpop.permute.xlu1 %809  ;;  %v808_v53 = vpop.permute.xlu0 %807 }
 0x544   :  { %v817_v54 = vsel %vm1552_vm2, %v808_v53, %v810_v52 }
 0x545   :  { %v818_v55 = vmax.f32 %v784_v42, %v817_v54 }
 0x547   :  { %821 = vrot.lane.b32.xlu1 %v818_v55, %s1341_s10  ;;  %819 = vrot.lane.b32.xlu0 %v818_v55, %s1340_s8  ;;  %v796_v57 = vpop.permute.xlu1 %795 }
 0x548   :  { %vm798_vm3 = vcmp.eq.s32.totalorder %v796_v57, %v797_v56 }
 0x549   :  { %v823_v58 = vsel %vm798_vm3, 1, %v1335_v0 }
 0x54a   :  { %v827_v59 = vrot.slane %v823_v58, %v1500_v44 }
 0x54b   :  { %799 = vrot.lane.b32.xlu0 %v1535_v31, %s1331_s24 }
 0x54c   :  { %vm1565_vm4 = vcmp.eq.s32.totalorder %v827_v59, 1 }
 0x5b9   :  { %v822_v61 = vpop.permute.xlu1 %821  ;;  %v820_v62 = vpop.permute.xlu0 %819 }
 0x5ba   :  { %v829_v63 = vsel %vm1565_vm4, %v820_v62, %v822_v61 }
 0x5bb   :  { %v830_v1 = vmax.f32 %v818_v55, %v829_v63 }
 0x5bd   :  { %833 = vrot.lane.b32.xlu0 %v830_v1, %s1342_s3  ;;  %831 = vrot.lane.b32.xlu1 %v830_v1, %s1331_s24  ;;  %v800_v3 = vpop.permute.xlu0 %799 }
 0x5be   :  { %vm802_vm5 = vcmp.eq.s32.totalorder %v800_v3, %v801_v2 }
 0x5bf   :  { %v835_v4 = vsel %vm802_vm5, 1, %v1335_v0 }
 0x5c0   :  { %v839_v5 = vrot.slane %v835_v4, %v1500_v44 }
 0x5c1   :  { %803 = vrot.lane.b32.xlu1 %v1535_v31, %s1327_s28 }
 0x5c2   :  { %vm1578_vm6 = vcmp.eq.s32.totalorder %v839_v5, 1 }
 0x62f   :  { %v832_v7 = vpop.permute.xlu1 %831  ;;  %v834_v8 = vpop.permute.xlu0 %833 }
 0x630   :  { %v841_v9 = vsel %vm1578_vm6, %v832_v7, %v834_v8 }
 0x631   :  { %v842_v10 = vmax.f32 %v830_v1, %v841_v9 }
 0x633   :  { %845 = vrot.lane.b32.xlu1 %v842_v10, %s1343_s21  ;;  %843 = vrot.lane.b32.xlu0 %v842_v10, %s1327_s28  ;;  %v804_v12 = vpop.permute.xlu1 %803 }
 0x634   :  { %vm806_vm7 = vcmp.eq.s32.totalorder %v804_v12, %v805_v11 }
 0x635   :  { %v847_v13 = vsel %vm806_vm7, 1, %v1335_v0 }
 0x636   :  { %v851_v14 = vrot.slane %v847_v13, %v1500_v44 }
 0x638   :  { %vm1589_vm8 = vcmp.eq.s32.totalorder %v851_v14, 1 }
 0x6a5   :  { %v846_v16 = vpop.permute.xlu1 %845  ;;  %v844_v17 = vpop.permute.xlu0 %843 }
 0x6a6   :  { %v853_v18 = vsel %vm1589_vm8, %v844_v17, %v846_v16 }
 0x6a7   :  { %v854_v19 = vmax.f32 %v842_v10, %v853_v18 }
 0x6a9   :  { %v855_v20 = vsub.f32 %v784_v42, %v854_v19 }
 0x6ab   :  { %v856_v21 = vmul.f32 1.442695, %v855_v20 }
 0x6ad   :  { %1157 = vpow2.f32 %v856_v21 }
 0x6b7   :  { %v1158_v22 = vpop.eup %1157 }
 0x6b8   :  { %860 = vrot.lane.b32.xlu1 %v1158_v22, %s1339_s1  ;;  %858 = vrot.lane.b32.xlu0 %v1158_v22, %s1338_s5 }
 0x72a   :  { %v861_v0 = vpop.permute.xlu1 %860  ;;  %v859_v44 = vpop.permute.xlu0 %858 }
 0x72b   :  { %v862_v23 = vsel %vm1552_vm2, %v859_v44, %v861_v0 }
 0x72c   :  { %v863_v24 = vadd.f32 %v1158_v22, %v862_v23 }
 0x72e   :  { %866 = vrot.lane.b32.xlu1 %v863_v24, %s1341_s10  ;;  %864 = vrot.lane.b32.xlu0 %v863_v24, %s1340_s8 }
 0x7a0   :  { %v867_v25 = vpop.permute.xlu1 %866  ;;  %v865_v26 = vpop.permute.xlu0 %864 }
 0x7a1   :  { %v868_v27 = vsel %vm1565_vm4, %v865_v26, %v867_v25 }
 0x7a2   :  { %v869_v28 = vadd.f32 %v868_v27, %v863_v24 }
 0x7a4   :  { %872 = vrot.lane.b32.xlu1 %v869_v28, %s1342_s3  ;;  %870 = vrot.lane.b32.xlu0 %v869_v28, %s1331_s24  ;;  %s892_s24 = sshll.u32 %s1344_s25, 4  ;;  %s893_s24 = int_to_ptr.vmem [resolvable:$true] %s892_s24 }
 0x7a5   :  { %s1293_s26 = scalar_lea.vmem %s893_s24, 128  ;;  %p1298_p7 = scmp.lt.s32.totalorder %s893_s24, %s893_s24 }
 0x7a6   :  { %p1294_p6 = scmp.ne.s32.totalorder %s893_s24, %s1293_s26  ;;  %p1299_p8 = scmp.lt.s32.totalorder %s1293_s26, %s1293_s26 }
 0x7a8   :  { %p1300_p9 = por %p1299_p8, %p1298_p7 }
 0x7aa   :  { %p1301_p10 = pnand %p1300_p9, %p1294_p6 }
 0x816   :  { %v873_v29 = vpop.permute.xlu1 %872  ;;  %v871_v30 = vpop.permute.xlu0 %870 }
 0x817   :  { %v874_v31 = vsel %vm1578_vm6, %v871_v30, %v873_v29 }
 0x818   :  { %v875_v32 = vadd.f32 %v874_v31, %v869_v28 }
 0x81a   :  { %878 = vrot.lane.b32.xlu1 %v875_v32, %s1343_s21  ;;  %876 = vrot.lane.b32.xlu0 %v875_v32, %s1327_s28 }
 0x88c   :  { %v879_v33 = vpop.permute.xlu1 %878  ;;  %v877_v34 = vpop.permute.xlu0 %876 }
 0x88d   :  { %v880_v35 = vsel %vm1589_vm8, %v877_v34, %v879_v33 }
 0x88e   :  { %v881_v37 = vadd.f32 %v880_v35, %v875_v32 }
 0x890   :  { %1159 = vlog2.f32 %v881_v37 }
 0x89a   :  { %v1160_v38 = vpop.eup %1159 }
 0x89b   :  { %v883_v39 = vmul.f32 0.6931472, %v1160_v38 }
 0x89d   :  { %v884_v36 = vsub.f32 %v855_v20, %v883_v39 }
 0x89f   :  { %885 = vst [vmem:[#allocation13] sm:$0xff] %v884_v36 }
 0x8a0   :  { %1304 = shalt.err (!%p1301_p10)
}
 0x8a1   :  { %s1305_s29 = scalar_lea.hbm %s1634_s11, 128 }
 0x8a2   :  { %p1306_p11 = scmp.ne.s32.totalorder %s1634_s11, %s1305_s29  ;;  %p1309_p12 = scmp.lt.u32.totalorder %s1305_s29, %s1634_s11 }
 0x8a4   :  { %p1311_p13 = pnand %p1309_p12, %p1306_p11 }
 0x8a6   :  { %1314 = shalt.err (!%p1311_p13)
}
 0x8a7   :  { %895 = dma.vmem_to_hbm [thread:$0]  %s893_s24, 128, %s1634_s11, [#allocation4]  }
 0x8a8   :  { %1323 = dma.done.wait [#allocation4], 128  }
 0x8a9   :  { %1324 = vsyncadd [#allocation4], 4294967168 }
 0x8aa   :  { %899 = vsyncpa [#allocation3], 1 }
 0x8ab   :  { %900 = vsyncpa [#allocation6], 1 }
 0x8ac   :  { %901 = vsyncpa [#allocation9], 1 }
 0x8ad   :  { %902 = vsyncpa [#allocation12], 1 }
 0x8ae   :  { %903 = vsyncpa [#allocation4], 1 }

</bundles_post_ra>
